<compile_context>
chip_gen: v7x
topology: tpu7x:2x2x1
jax: 0.10.0
libtpu: 0.0.40
codegen_flags: <defaults>
</compile_context>

<pallas_src>
import jax
import jax.numpy as jnp
from jax.experimental import pallas as pl
from jax.experimental.pallas import tpu as pltpu

IN_FEATURES = 500
HIDDEN = 22
MAX_TB = 1024  # rows per grid step; safe for default scoped VMEM on all gens


def _round_up(n, m):
    return (n + m - 1) // m * m


def mlp_prior_kernel(x_ref, l1_ref, w2t_ref, b2_ref, layer1_ref, layer2_ref):
    # layer1_out = self.linear1 * x   (broadcast (1,500) over (TB,500), VPU)
    layer1 = x_ref[...] * l1_ref[...]
    layer1_ref[...] = layer1

    # layer2_out = relu(Linear(500 -> 22)(layer1_out))   (MXU, f32 accumulate)
    h = jnp.dot(layer1, w2t_ref[...], preferred_element_type=jnp.float32)
    layer2_ref[...] = jnp.maximum(h + b2_ref[...], 0.0)


def mlp_prior_forward(x, params):
    """x: [B, 500] float32. Returns (out [B,1], layer1_out [B,500], layer2_out [B,22])."""
    B = x.shape[0]
    l1, w2t, b2, w3t, b3 = params

    # Choose a tile size and pad the batch so the grid divides evenly.
    TB = MAX_TB if B >= MAX_TB else _round_up(B, 8)
    Bp = _round_up(B, TB)
    x_p = jnp.pad(x, ((0, Bp - B), (0, 0))) if Bp != B else x
    grid = (Bp // TB,)

    out_shapes = (
        jax.ShapeDtypeStruct((Bp, IN_FEATURES), jnp.float32),  # layer1_out
        jax.ShapeDtypeStruct((Bp, HIDDEN), jnp.float32),       # layer2_out
    )

    in_specs = [
        pl.BlockSpec((TB, IN_FEATURES), lambda i: (i, 0)),          # x (streamed)
        pl.BlockSpec((1, IN_FEATURES), lambda i: (0, 0)),           # linear1 param
        pl.BlockSpec((IN_FEATURES, HIDDEN), lambda i: (0, 0)),      # W2^T
        pl.BlockSpec((1, HIDDEN), lambda i: (0, 0)),                # b2
    ]
    out_specs = (
        pl.BlockSpec((TB, IN_FEATURES), lambda i: (i, 0)),          # layer1_out
        pl.BlockSpec((TB, HIDDEN), lambda i: (i, 0)),               # layer2_out
    )

    cost = pl.CostEstimate(
        flops=2 * Bp * IN_FEATURES * HIDDEN + Bp * IN_FEATURES,
        bytes_accessed=Bp * (IN_FEATURES + IN_FEATURES + HIDDEN) * 4
        + (IN_FEATURES + IN_FEATURES * HIDDEN + HIDDEN) * 4,
        transcendentals=0,
    )

    layer1_p, layer2_p = pl.pallas_call(
        mlp_prior_kernel,
        out_shape=out_shapes,
        grid=grid,
        in_specs=in_specs,
        out_specs=out_specs,
        compiler_params=pltpu.CompilerParams(
            dimension_semantics=("parallel",),
        ),
        cost_estimate=cost,
    )(x_p, l1, w2t, b2)

    layer1_out = layer1_p[:B]
    layer2_out = layer2_p[:B]

    # Final Linear(22 -> 1) + sigmoid, hoisted to XLA (lane-sparse, ~22 FLOPs/row).
    out = jax.nn.sigmoid(layer2_out @ w3t + b3)
    return out, layer1_out, layer2_out


def init_params(key):
    """Deterministic synthetic parameters matching MLP_prior.__init__ shapes."""
    k1, k2, k3, k4, k5 = jax.random.split(key, 5)
    # self.linear1 = Parameter(randn(500))  -> kept as (1, 500) for broadcasting
    linear1 = jax.random.normal(k1, (1, IN_FEATURES), dtype=jnp.float32)
    # self.linear2 = Linear(500, 22): weight (22, 500), bias (22,)
    bound2 = 1.0 / (IN_FEATURES ** 0.5)
    w2 = jax.random.uniform(k2, (HIDDEN, IN_FEATURES), jnp.float32, -bound2, bound2)
    b2 = jax.random.uniform(k3, (1, HIDDEN), jnp.float32, -bound2, bound2)
    # self.linear3 = Linear(22, 1): weight (1, 22), bias (1,)
    bound3 = 1.0 / (HIDDEN ** 0.5)
    w3 = jax.random.uniform(k4, (1, HIDDEN), jnp.float32, -bound3, bound3)
    b3 = jax.random.uniform(k5, (1, 1), jnp.float32, -bound3, bound3)
    # pre-transpose weights for row-major matmuls
    return (linear1, w2.T, b2, w3.T, b3)


def reference_forward(x, params):
    l1, w2t, b2, w3t, b3 = params
    layer1 = l1 * x
    layer2 = jnp.maximum(layer1 @ w2t + b2, 0.0)
    out = jax.nn.sigmoid(layer2 @ w3t + b3)
    return out, layer1, layer2


if __name__ == "__main__":
    key = jax.random.PRNGKey(0)
    kp, kx = jax.random.split(key)
    params = init_params(kp)

    batch = 8
    x = jax.random.normal(kx, (batch, IN_FEATURES), dtype=jnp.float32)

    out, layer1_out, layer2_out = mlp_prior_forward(x, params)
    jax.block_until_ready((out, layer1_out, layer2_out))

    # sanity check against pure-JAX reference
    ref_out, ref_l1, ref_l2 = reference_forward(x, params)
    assert jnp.allclose(out, ref_out, atol=1e-5, rtol=1e-5)
    assert jnp.allclose(layer1_out, ref_l1, atol=1e-5, rtol=1e-5)
    assert jnp.allclose(layer2_out, ref_l2, atol=1e-5, rtol=1e-5)
    assert out.shape == (batch, 1)
    assert layer1_out.shape == (batch, IN_FEATURES)
    assert layer2_out.shape == (batch, HIDDEN)

    # also exercise a non-multiple-of-TB larger batch to check tiling/tail path
    big = 1536 + 8
    xb = jax.random.normal(kx, (big, IN_FEATURES), dtype=jnp.float32)
    ob, l1b, l2b = mlp_prior_forward(xb, params)
    jax.block_until_ready((ob, l1b, l2b))
    rob, rl1b, rl2b = reference_forward(xb, params)
    assert jnp.allclose(ob, rob, atol=1e-5, rtol=1e-5)
    assert jnp.allclose(l1b, rl1b, atol=1e-5, rtol=1e-5)
    assert jnp.allclose(l2b, rl2b, atol=1e-5, rtol=1e-5)

    print("KERNEL_OK")
</pallas_src>

<mosaic_0001>
module attributes {stable_mosaic.version = 11 : i64} {
  func.func @mlp_prior_kernel(%arg0: i32, %arg1: memref<8x500xf32, #tpu.memory_space<vmem>>, %arg2: memref<1x500xf32, #tpu.memory_space<vmem>>, %arg3: memref<500x22xf32, #tpu.memory_space<vmem>>, %arg4: memref<1x22xf32, #tpu.memory_space<vmem>>, %arg5: memref<8x500xf32, #tpu.memory_space<vmem>>, %arg6: memref<8x22xf32, #tpu.memory_space<vmem>>) attributes {dimension_semantics = [#tpu.dimension_semantics<parallel>], iteration_bounds = array<i64: 1>, scalar_prefetch = 0 : i64, scratch_operands = 0 : i64, tpu.core_type = #tpu.core_type<tc>, window_params = [{transform_indices = @transform_0, window_bounds = array<i64: 8, 500>}, {pipeline_mode = #tpu.pipeline_mode<synchronous>, transform_indices = @transform_1, window_bounds = array<i64: 1, 500>}, {pipeline_mode = #tpu.pipeline_mode<synchronous>, transform_indices = @transform_2, window_bounds = array<i64: 500, 22>}, {pipeline_mode = #tpu.pipeline_mode<synchronous>, transform_indices = @transform_3, window_bounds = array<i64: 1, 22>}, {transform_indices = @transform_4, window_bounds = array<i64: 8, 500>}, {transform_indices = @transform_5, window_bounds = array<i64: 8, 22>}]} {
    %c0 = arith.constant 0 : index
    %c0_0 = arith.constant 0 : index
    %0 = vector.load %arg1[%c0, %c0_0] : memref<8x500xf32, #tpu.memory_space<vmem>>, vector<8x500xf32>
    %c0_1 = arith.constant 0 : index
    %c0_2 = arith.constant 0 : index
    %1 = vector.load %arg2[%c0_1, %c0_2] : memref<1x500xf32, #tpu.memory_space<vmem>>, vector<1x500xf32>
    %2 = vector.broadcast %1 : vector<1x500xf32> to vector<8x500xf32>
    %3 = arith.mulf %0, %2 : vector<8x500xf32>
    %c0_3 = arith.constant 0 : index
    %c0_4 = arith.constant 0 : index
    %4 = vector.load %arg5[%c0_3, %c0_4] : memref<8x500xf32, #tpu.memory_space<vmem>>, vector<8x500xf32>
    tpu.vector_store %arg5[%c0_3, %c0_4], %3 {strides = array<i32>} : memref<8x500xf32, #tpu.memory_space<vmem>>, vector<8x500xf32>,
    %c0_5 = arith.constant 0 : index
    %c0_6 = arith.constant 0 : index
    %5 = vector.load %arg3[%c0_5, %c0_6] : memref<500x22xf32, #tpu.memory_space<vmem>>, vector<500x22xf32>
    %cst = arith.constant dense<0.000000e+00> : vector<8x22xf32>
    %6 = tpu.matmul %3, %5, %cst {dimension_numbers = #tpu.dot_dimension_numbers<[1], [0], [0], [1], [0, 0, 1, 1], [], []>} : vector<8x500xf32>, vector<500x22xf32>, vector<8x22xf32> -> vector<8x22xf32>
    %c0_7 = arith.constant 0 : index
    %c0_8 = arith.constant 0 : index
    %7 = vector.load %arg4[%c0_7, %c0_8] : memref<1x22xf32, #tpu.memory_space<vmem>>, vector<1x22xf32>
    %8 = vector.broadcast %7 : vector<1x22xf32> to vector<8x22xf32>
    %9 = arith.addf %6, %8 : vector<8x22xf32>
    %cst_9 = arith.constant 0.000000e+00 : f32
    %10 = vector.broadcast %cst_9 : f32 to vector<8x22xf32>
    %11 = arith.maximumf %9, %10 : vector<8x22xf32>
    %c0_10 = arith.constant 0 : index
    %c0_11 = arith.constant 0 : index
    %12 = vector.load %arg6[%c0_10, %c0_11] : memref<8x22xf32, #tpu.memory_space<vmem>>, vector<8x22xf32>
    tpu.vector_store %arg6[%c0_10, %c0_11], %11 {strides = array<i32>} : memref<8x22xf32, #tpu.memory_space<vmem>>, vector<8x22xf32>,
    return
  }
  func.func @transform_0(%arg0: i32) -> (i32, i32) {
    %c0_i32 = arith.constant 0 : i32
    %c0_i32_0 = arith.constant 0 : i32
    return %arg0, %c0_i32 : i32, i32
  }
  func.func @transform_1(%arg0: i32) -> (i32, i32) {
    %c0_i32 = arith.constant 0 : i32
    %c0_i32_0 = arith.constant 0 : i32
    %c0_i32_1 = arith.constant 0 : i32
    return %c0_i32, %c0_i32_0 : i32, i32
  }
  func.func @transform_2(%arg0: i32) -> (i32, i32) {
    %c0_i32 = arith.constant 0 : i32
    %c0_i32_0 = arith.constant 0 : i32
    %c0_i32_1 = arith.constant 0 : i32
    return %c0_i32, %c0_i32_0 : i32, i32
  }
  func.func @transform_3(%arg0: i32) -> (i32, i32) {
    %c0_i32 = arith.constant 0 : i32
    %c0_i32_0 = arith.constant 0 : i32
    %c0_i32_1 = arith.constant 0 : i32
    return %c0_i32, %c0_i32_0 : i32, i32
  }
  func.func @transform_4(%arg0: i32) -> (i32, i32) {
    %c0_i32 = arith.constant 0 : i32
    %c0_i32_0 = arith.constant 0 : i32
    return %arg0, %c0_i32 : i32, i32
  }
  func.func @transform_5(%arg0: i32) -> (i32, i32) {
    %c0_i32 = arith.constant 0 : i32
    %c0_i32_0 = arith.constant 0 : i32
    return %arg0, %c0_i32 : i32, i32
  }
}

</mosaic_0001>

<bundles_post_ra>
// kernel: tpu_custom_call.1
= control target key start
LH: loop header
LB: loop body
LE: loop exit
PB: predicated region body
PF: predicated region fallthrough
CT: control target
= control target key end

     0   :  { %11 = vsyncpa [#allocation3], 0  ;;  %v471_v3 = vmov 0.0|0.0   ;;  %v27_v26 = vlaneseq  ;;  %vm54_vm0 = vcmask 949248   ;;  %s757_s0 = inlined_call_operand.vmem [shape: f32[8,500], index: 0, kind: input, shape index: {}]   ;;  %s758_s1 = inlined_call_operand.vmem [shape: f32[1,500], index: 1, kind: input, shape index: {}]   ;;  %s759_s2 = inlined_call_operand.vmem [shape: f32[500,22], index: 2, kind: input, shape index: {}]   ;;  %s760_s3 = inlined_call_operand.vmem [shape: f32[1,22], index: 3, kind: input, shape index: {}]   ;;  %s761_s4 = inlined_call_operand.hbm [shape: f32[8,500], index: 4, kind: output, shape index: {0}]   ;;  %s762_s5 = inlined_call_operand.hbm [shape: f32[8,22], index: 5, kind: output, shape index: {1}]  }
   0x1   :  { %v88_v0 = vld [vmem:[%s759_s2 + $0x100] sm:$0xff]  ;;  %v89_v1 = vld [vmem:[%s759_s2 + $0x108] sm:$0xff]  ;;  %v90_v2 = vld [vmem:[%s759_s2 + $0x110] sm:$0xff]  ;;  %374 = vmatprep.subr.bf16.mxu1 %v471_v3 }
   0x2   :  { %v375_v4 = vpack.c.bf16 %v89_v1, %v88_v0  ;;  %v91_v5 = vld [vmem:[%s759_s2 + $0x118] sm:$0xff]  ;;  %v92_v7 = vld [vmem:[%s759_s2 + $0x120] sm:$0xff]  ;;  %v93_v8 = vld [vmem:[%s759_s2 + $0x128] sm:$0xff]  ;;  %v28_v36 = vshrl.u32 %v27_v26, 7 }
   0x3   :  { %v378_v6 = vpack.c.bf16 %v91_v5, %v90_v2  ;;  %v72_v9 = vld [vmem:[%s759_s2 + $0x80] sm:$0xff]  ;;  %v73_v10 = vld [vmem:[%s759_s2 + $0x88] sm:$0xff]  ;;  %v74_v15 = vld [vmem:[%s759_s2 + $0x90] sm:$0xff]  ;;  %v381_v18 = vpack.c.bf16 %v93_v8, %v92_v7 }
   0x4   :  { %376 = vmatpush1.bf16.msra.mxu1 %v375_v4  ;;  %v56_v11 = vld [vmem:[%s759_s2] sm:$0xff]  ;;  %v342_v12 = vpack.c.bf16 %v73_v10, %v72_v9  ;;  %v57_v13 = vld [vmem:[%s759_s2 + $0x8] sm:$0xff]  ;;  %v75_v16 = vld [vmem:[%s759_s2 + $0x98] sm:$0xff]  ;;  %v33_v47 = vsub.s32 1, %v28_v36  ;;  %v29_v52 = vsub.s32 0, %v28_v36  ;;  %v41_v53 = vsub.s32 3, %v28_v36 }
   0x5   :  { %377 = vmatprep.subr.bf16.mxu1 %v471_v3  ;;  %v344_v14 = vpack.c.bf16 %v57_v13, %v56_v11  ;;  %v58_v17 = vld [vmem:[%s759_s2 + $0x10] sm:$0xff]  ;;  %v346_v20 = vpack.c.bf16 %v75_v16, %v74_v15  ;;  %v59_v21 = vld [vmem:[%s759_s2 + $0x18] sm:$0xff]  ;;  %v76_v24 = vld [vmem:[%s759_s2 + $0xa0] sm:$0xff]  ;;  %v37_v54 = vsub.s32 2, %v28_v36 }
   0x6   :  { %v94_v19 = vld [vmem:[%s759_s2 + $0x130] sm:$0xff]  ;;  %343 = vmatprep.subr.bf16.mxu0 %v342_v12  ;;  %v95_v22 = vld [vmem:[%s759_s2 + $0x138] sm:$0xff]  ;;  %v348_v23 = vpack.c.bf16 %v59_v21, %v58_v17  ;;  %v77_v25 = vld [vmem:[%s759_s2 + $0xa8] sm:$0xff] }
   0x7   :  { %345 = vmatpush3.bf16.msra.mxu0 %v344_v14  ;;  %v350_v27 = vpack.c.bf16 %v77_v25, %v76_v24  ;;  %v60_v28 = vld [vmem:[%s759_s2 + $0x20] sm:$0xff]  ;;  %v61_v29 = vld [vmem:[%s759_s2 + $0x28] sm:$0xff]  ;;  %v78_v30 = vld [vmem:[%s759_s2 + $0xb0] sm:$0xff]  ;;  %v384_v32 = vpack.c.bf16 %v95_v22, %v94_v19 }
   0x8   :  { %379 = vmatpush1.bf16.msra.mxu1 %v378_v6  ;;  %347 = vmatprep.subr.bf16.mxu0 %v346_v20  ;;  %v79_v31 = vld [vmem:[%s759_s2 + $0xb8] sm:$0xff]  ;;  %v96_v33 = vld [vmem:[%s759_s2 + $0x140] sm:$0xff]  ;;  %v97_v34 = vld [vmem:[%s759_s2 + $0x148] sm:$0xff]  ;;  %v352_v35 = vpack.c.bf16 %v61_v29, %v60_v28 }
   0x9   :  { %380 = vmatprep.subr.bf16.mxu1 %v471_v3  ;;  %v354_v37 = vpack.c.bf16 %v79_v31, %v78_v30  ;;  %v62_v38 = vld [vmem:[%s759_s2 + $0x30] sm:$0xff]  ;;  %v63_v39 = vld [vmem:[%s759_s2 + $0x38] sm:$0xff]  ;;  %v80_v40 = vld [vmem:[%s759_s2 + $0xc0] sm:$0xff]  ;;  %v387_v42 = vpack.c.bf16 %v97_v34, %v96_v33 }
   0xa   :  { %v81_v41 = vld [vmem:[%s759_s2 + $0xc8] sm:$0xff]  ;;  %v98_v43 = vld [vmem:[%s759_s2 + $0x150] sm:$0xff]  ;;  %v99_v44 = vld [vmem:[%s759_s2 + $0x158] sm:$0xff]  ;;  %v356_v45 = vpack.c.bf16 %v63_v39, %v62_v38 }
   0xb   :  { %349 = vmatpush3.bf16.msra.mxu0 %v348_v23  ;;  %v64_v46 = vld [vmem:[%s759_s2 + $0x40] sm:$0xff]  ;;  %v358_v48 = vpack.c.bf16 %v81_v41, %v80_v40  ;;  %v65_v49 = vld [vmem:[%s759_s2 + $0x48] sm:$0xff]  ;;  %v82_v50 = vld [vmem:[%s759_s2 + $0xd0] sm:$0xff]  ;;  %v390_v55 = vpack.c.bf16 %v99_v44, %v98_v43 }
   0xc   :  { %382 = vmatpush1.bf16.msra.mxu1 %v381_v18  ;;  %351 = vmatprep.subr.bf16.mxu0 %v350_v27  ;;  %v83_v51 = vld [vmem:[%s759_s2 + $0xd8] sm:$0xff]  ;;  %v100_v56 = vld [vmem:[%s759_s2 + $0x160] sm:$0xff]  ;;  %v101_v57 = vld [vmem:[%s759_s2 + $0x168] sm:$0xff]  ;;  %v360_v59 = vpack.c.bf16 %v65_v49, %v64_v46 }
   0xd   :  { %383 = vmatprep.subr.bf16.mxu1 %v471_v3  ;;  %v66_v58 = vld [vmem:[%s759_s2 + $0x50] sm:$0xff]  ;;  %v362_v60 = vpack.c.bf16 %v83_v51, %v82_v50  ;;  %v22_v61 = vld [vmem:[%s757_s0 + $0x8] sm:$0xff]  ;;  %v25_v62 = vld [vmem:[%s758_s1] sm:$0xf]  ;;  %v393_v8 = vpack.c.bf16 %v101_v57, %v100_v56 }
   0xe   :  { %v21_v63 = vld [vmem:[%s757_s0] sm:$0xff]  ;;  %v67_v0 = vld [vmem:[%s759_s2 + $0x58] sm:$0xff]  ;;  %v85_v2 = vld [vmem:[%s759_s2 + $0xe8] sm:$0xff]  ;;  %v34_v4 = vrot.slane %v25_v62, %v33_v47  ;;  %v30_v5 = vrot.slane %v25_v62, %v29_v52  ;;  %v42_v6 = vrot.slane %v25_v62, %v41_v53  ;;  %v38_v7 = vrot.slane %v25_v62, %v37_v54 }
   0xf   :  { %353 = vmatpush3.bf16.msra.mxu0 %v352_v35  ;;  %v84_v1 = vld [vmem:[%s759_s2 + $0xe0] sm:$0xff]  ;;  %v24_v9 = vld [vmem:[%s757_s0 + $0x18] sm:$0xff]  ;;  %v23_v10 = vld [vmem:[%s757_s0 + $0x10] sm:$0xff] }
  0x10   :  { %385 = vmatpush1.bf16.msra.mxu1 %v384_v32  ;;  %355 = vmatprep.subr.bf16.mxu0 %v354_v37 }
  0x11   :  { %386 = vmatprep.subr.bf16.mxu1 %v471_v3 }
  0x13   :  { %357 = vmatpush3.bf16.msra.mxu0 %v356_v45 }
  0x14   :  { %388 = vmatpush1.bf16.msra.mxu1 %v387_v42  ;;  %359 = vmatprep.subr.bf16.mxu0 %v358_v48 }
  0x15   :  { %389 = vmatprep.subr.bf16.mxu1 %v471_v3 }
  0x16   :  { %12 = vsyncpa [#allocation5], 0  ;;  %v48_v11 = vmul.f32 %v34_v4, %v22_v61  ;;  %v47_v12 = vmul.f32 %v30_v5, %v21_v63  ;;  %v50_v13 = vmul.f32 %v42_v6, %v24_v9  ;;  %v646_v14 = vmul.f32 %v38_v7, %v23_v10  ;;  %v102_v15 = vld [vmem:[%s759_s2 + $0x170] sm:$0xff]  ;;  %v103_v16 = vld [vmem:[%s759_s2 + $0x178] sm:$0xff]  ;;  %s473_s25 = smov [#allocation2]  }
  0x17   :  { %361 = vmatpush3.bf16.msra.mxu0 %v360_v59  ;;  %v364_v17 = vpack.c.bf16 %v67_v0, %v66_v58  ;;  %v366_v18 = vpack.c.bf16 %v85_v2, %v84_v1  ;;  %v68_v19 = vld [vmem:[%s759_s2 + $0x60] sm:$0xff]  ;;  %v69_v20 = vld [vmem:[%s759_s2 + $0x68] sm:$0xff]  ;;  %v86_v21 = vld [vmem:[%s759_s2 + $0xf0] sm:$0xff]  ;;  %v396_v23 = vpack.c.bf16 %v103_v16, %v102_v15  ;;  %v472_v50 = vmov 0.0   ;;  %s282_s26 = sshll.u32 %s473_s25, 4  ;;  %s283_s26 = int_to_ptr.vmem [resolvable:$true] %s282_s26 }
  0x18   :  { %391 = vmatpush1.bf16.msra.mxu1 %v390_v55  ;;  %363 = vmatprep.subr.bf16.mxu0 %v362_v60  ;;  %52 = vst [vmem:[#allocation2 + $0x8] sm:$0xff] %v48_v11  ;;  %51 = vst [vmem:[#allocation2] sm:$0xff] %v47_v12  ;;  %v87_v22 = vld [vmem:[%s759_s2 + $0xf8] sm:$0xff]  ;;  %v104_v24 = vld [vmem:[%s759_s2 + $0x180] sm:$0xff]  ;;  %v368_v26 = vpack.c.bf16 %v69_v20, %v68_v19  ;;  %vm129_vm1 = vcmask 1043456   ;;  %s423_s27 = scalar_lea.vmem %s283_s26, 512  ;;  %p428_p1 = scmp.lt.s32.totalorder %s283_s26, %s283_s26 }
  0x19   :  { %392 = vmatprep.subr.bf16.mxu1 %v471_v3  ;;  %197 = vmatprep.mubr.f32.mxu0 %v48_v11  ;;  %55 = vst.msk [vmem:[#allocation2 + $0x18] sm:$0xff] %vm54_vm0, %v50_v13  ;;  %53 = vst [vmem:[#allocation2 + $0x10] sm:$0xff] %v646_v14  ;;  %v105_v25 = vld [vmem:[%s759_s2 + $0x188] sm:$0xff]  ;;  %v370_v27 = vpack.c.bf16 %v87_v22, %v86_v21  ;;  %v70_v28 = vld [vmem:[%s759_s2 + $0x70] sm:$0xff]  ;;  %p424_p0 = scmp.ne.s32.totalorder %s283_s26, %s423_s27  ;;  %p429_p2 = scmp.lt.s32.totalorder %s423_s27, %s423_s27 }
  0x1a   :  { %306 = vmatprep.mubr.msk.f32.mxu1 %vm54_vm0, %v50_v13  ;;  %v71_v29 = vld [vmem:[%s759_s2 + $0x78] sm:$0xff]  ;;  %v399_v30 = vpack.c.bf16 %v105_v25, %v104_v24  ;;  %v106_v31 = vld [vmem:[%s759_s2 + $0x190] sm:$0xff]  ;;  %v108_v35 = vld [vmem:[%s759_s2 + $0x1a0] sm:$0xff] }
  0x1b   :  { %365 = vmatpush3.bf16.msra.mxu0 %v364_v17  ;;  %v107_v32 = vld [vmem:[%s759_s2 + $0x198] sm:$0xff]  ;;  %v372_v33 = vpack.c.bf16 %v71_v29, %v70_v28  ;;  %v109_v36 = vld [vmem:[%s759_s2 + $0x1a8] sm:$0xff]  ;;  %v110_v38 = vld [vmem:[%s759_s2 + $0x1b0] sm:$0xff]  ;;  %p430_p3 = por %p429_p2, %p428_p1 }
  0x1c   :  { %394 = vmatpush1.bf16.msra.mxu1 %v393_v8  ;;  %367 = vmatprep.subr.bf16.mxu0 %v366_v18  ;;  %v402_v34 = vpack.c.bf16 %v107_v32, %v106_v31  ;;  %v405_v37 = vpack.c.bf16 %v109_v36, %v108_v35  ;;  %v111_v39 = vld [vmem:[%s759_s2 + $0x1b8] sm:$0xff]  ;;  %v112_v41 = vld [vmem:[%s759_s2 + $0x1c0] sm:$0xff]  ;;  %v113_v42 = vld [vmem:[%s759_s2 + $0x1c8] sm:$0xff] }
  0x1d   :  { %395 = vmatprep.subr.bf16.mxu1 %v471_v3  ;;  %v408_v40 = vpack.c.bf16 %v111_v39, %v110_v38  ;;  %v411_v43 = vpack.c.bf16 %v113_v42, %v112_v41  ;;  %v114_v44 = vld [vmem:[%s759_s2 + $0x1d0] sm:$0xff]  ;;  %v115_v45 = vld [vmem:[%s759_s2 + $0x1d8] sm:$0xff]  ;;  %v116_v47 = vld [vmem:[%s759_s2 + $0x1e0] sm:$0xff]  ;;  %p431_p4 = pnand %p430_p3, %p424_p0 }
  0x1e   :  { %v414_v46 = vpack.c.bf16 %v115_v45, %v114_v44  ;;  %v117_v48 = vld [vmem:[%s759_s2 + $0x1e8] sm:$0xff]  ;;  %v118_v51 = vld [vmem:[%s759_s2 + $0x1f0] sm:$0xf] }
  0x1f   :  { %369 = vmatpush3.bf16.msra.mxu0 %v368_v26  ;;  %v417_v49 = vpack.c.bf16 %v117_v48, %v116_v47 }
  0x20   :  { %397 = vmatpush1.bf16.msra.mxu1 %v396_v23  ;;  %371 = vmatprep.subr.bf16.mxu0 %v370_v27 }
  0x21   :  { %398 = vmatprep.subr.bf16.mxu1 %v471_v3 }
  0x23   :  { %373 = vmatpush3.bf16.msra.mxu0 %v372_v33 }
  0x24   :  { %400 = vmatpush1.bf16.msra.mxu1 %v399_v30 }
  0x25   :  { %401 = vmatprep.subr.bf16.mxu1 %v471_v3 }
  0x26   :  { %198 = vmatmul.mubr.f32.vlgmr.msra.gmra.mrb[0].mxu0 %v47_v12 }
  0x28   :  { %403 = vmatpush1.bf16.msra.mxu1 %v402_v34 }
  0x29   :  { %404 = vmatprep.subr.bf16.mxu1 %v471_v3 }
  0x2c   :  { %406 = vmatpush1.bf16.msra.mxu1 %v405_v37 }
  0x2d   :  { %407 = vmatprep.subr.bf16.mxu1 %v471_v3 }
  0x30   :  { %409 = vmatpush1.bf16.msra.mxu1 %v408_v40 }
  0x31   :  { %410 = vmatprep.subr.bf16.mxu1 %v471_v3 }
  0x34   :  { %412 = vmatpush1.bf16.msra.mxu1 %v411_v43 }
  0x35   :  { %413 = vmatprep.subr.bf16.mxu1 %v471_v3 }
  0x38   :  { %415 = vmatpush1.bf16.msra.mxu1 %v414_v46 }
  0x39   :  { %416 = vmatprep.subr.bf16.mxu1 %v471_v3 }
  0x3c   :  { %418 = vmatpush1.bf16.msra.mxu1 %v417_v49 }
  0x3d   :  { %263 = vmatprep.subr.mxu1 %v472_v50 }
  0x40   :  { %305 = vmatpush1.msk.msra.mxu1 %vm129_vm1, %v118_v51 }
  0x41   :  { %268 = vmatmul.mubr.f32.vlgmr.msra.gmra.mrb[0].mxu1 %v646_v14 }
  0x42   :  { %434 = shalt.err (!%p431_p4)
}
  0x43   :  { %s435_s29 = scalar_lea.hbm %s761_s4, 512 }
  0x44   :  { %p436_p5 = scmp.ne.s32.totalorder %s761_s4, %s435_s29  ;;  %p439_p6 = scmp.lt.u32.totalorder %s435_s29, %s761_s4 }
  0x46   :  { %p441_p7 = pnand %p439_p6, %p436_p5 }
  0x48   :  { %444 = shalt.err (!%p441_p7)
}
  0x49   :  { %285 = dma.vmem_to_hbm [thread:$0]  %s283_s26, 512, %s761_s4, [#allocation3]   ;;  %v304_v54 = vld [vmem:[%s760_s3] ss:$0 sm:$0xff]  ;;  %vm274_vm2 = vcmask 179200  }
  0x4a   :  { %s474_s11 = smov [#allocation4]  }
  0x4b   :  { %s292_s12 = sshll.u32 %s474_s11, 4  ;;  %s293_s12 = int_to_ptr.vmem [resolvable:$true] %s292_s12 }
  0x4c   :  { %s445_s13 = scalar_lea.vmem %s293_s12, 128  ;;  %p450_p9 = scmp.lt.s32.totalorder %s293_s12, %s293_s12 }
  0x4d   :  { %p446_p8 = scmp.ne.s32.totalorder %s293_s12, %s445_s13  ;;  %p451_p10 = scmp.lt.s32.totalorder %s445_s13, %s445_s13 }
  0x4f   :  { %p452_p11 = por %p451_p10, %p450_p9 }
  0x51   :  { %p453_p12 = pnand %p452_p11, %p446_p8 }
  0xf9   :  { %v339_v3 = vpop.f32.mrb[0].mxu0 }
  0xfa   :  { %v340_v52 = vpop.f32.mrb[1].mxu0 }
  0xfb   :  { %v341_v53 = vadd.f32 %v340_v52, %v339_v3 }
  0xfd   :  { %v200_v55 = vadd.f32 %v341_v53, %v304_v54 }
 0x114   :  { %v269_v56 = vpop.f32.mrb[0].mxu1 }
 0x115   :  { %v270_v57 = vadd.f32 %v269_v56, %v200_v55  ;;  %v271_v58 = vpop.f32.mrb[1].mxu1 }
 0x117   :  { %v273_v59 = vmax.f32 %v270_v57, 0.0 }
 0x119   :  { %275 = vst.msk [vmem:[#allocation4] sm:$0xff] %vm274_vm2, %v273_v59 }
 0x11a   :  { %456 = shalt.err (!%p453_p12)
}
 0x11b   :  { %s457_s3 = scalar_lea.hbm %s762_s5, 128 }
 0x11c   :  { %p458_p13 = scmp.ne.s32.totalorder %s762_s5, %s457_s3  ;;  %p461_p0 = scmp.lt.u32.totalorder %s457_s3, %s762_s5 }
 0x11e   :  { %p463_p1 = pnand %p461_p0, %p458_p13 }
 0x120   :  { %466 = shalt.err (!%p463_p1)
}
 0x121   :  { %295 = dma.vmem_to_hbm [thread:$0]  %s293_s12, 128, %s762_s5, [#allocation5]  }
 0x122   :  { %467 = dma.done.wait [#allocation3], 512  }
 0x123   :  { %468 = vsyncadd [#allocation3], 4294966784 }
 0x124   :  { %469 = dma.done.wait [#allocation5], 128  }
 0x125   :  { %470 = vsyncadd [#allocation5], 4294967168 }
 0x126   :  { %302 = vsyncpa [#allocation3], 1 }
 0x127   :  { %303 = vsyncpa [#allocation5], 1 }

</bundles_post_ra>
